<compile_context>
chip_gen: v7x
topology: tpu7x:2x2x1
jax: 0.10.0
libtpu: 0.0.40
codegen_flags: <defaults>
</compile_context>

<pallas_src>
import functools

import jax
import jax.numpy as jnp
from jax.experimental import pallas as pl
from jax.experimental.pallas import tpu as pltpu


def _round_up(x, m):
    return ((x + m - 1) // m) * m


def _pick_tile(n_padded, cap=512):
    """Largest 128-multiple tile <= cap that divides n_padded (n_padded % 128 == 0)."""
    t = cap
    while t >= 128:
        if n_padded % t == 0:
            return t
        t -= 128
    return 128


# ---------------------------------------------------------------------------
# Kernel 1: fused propagation matmul + running-sum epilogue
#   acc(f32)   = A(bf16) @ E(bf16)                (accumulated over K tiles)
#   out(bf16)  = acc                              (input to the next layer)
#   sum_out    = (sum_in + acc) * scale           (running mean-over-layers)
# ---------------------------------------------------------------------------
def _prop_matmul_kernel(a_ref, e_ref, s_in_ref, o_ref, s_out_ref, acc_ref,
                        *, tk, scale, resident_e):
    k = pl.program_id(1)

    @pl.when(k == 0)
    def _():
        acc_ref[...] = jnp.zeros_like(acc_ref)

    if resident_e:
        # E is fully VMEM-resident (DMA'd once); slice the K chunk in-kernel.
        start = pl.multiple_of(k * tk, tk)
        e = e_ref[pl.ds(start, tk), :]
    else:
        e = e_ref[...]

    acc_ref[...] += jnp.dot(a_ref[...], e, preferred_element_type=jnp.float32)

    @pl.when(k == pl.num_programs(1) - 1)
    def _():
        acc = acc_ref[...]
        o_ref[...] = acc.astype(o_ref.dtype)
        s_out_ref[...] = (s_in_ref[...] + acc) * scale


def prop_matmul(a_bf16, e_bf16, sum_in_f32, *, tm, tk, scale,
                resident_e_budget=24 * 1024 * 1024):
    """a: [M,K] bf16 (padded), e: [K,Dp] bf16 (padded), sum_in: [M,Dp] f32.

    Returns (layer_out [M,Dp] bf16, new_sum [M,Dp] f32)."""
    M, K = a_bf16.shape
    K2, Dp = e_bf16.shape
    assert K == K2 and Dp % 128 == 0
    assert M % tm == 0 and K % tk == 0
    assert sum_in_f32.shape == (M, Dp)

    # Resident E if its (worst-case double-buffered) footprint is modest.
    # NOTE: on v7x one could add pipeline_mode=pl.Buffered(1) on the constant-
    #       index E spec to single-buffer it; budget here already accounts for 2x.
    resident_e = (2 * K * Dp * 2) <= resident_e_budget
    if resident_e:
        e_spec = pl.BlockSpec((K, Dp), lambda i, k: (0, 0))
    else:
        e_spec = pl.BlockSpec((tk, Dp), lambda i, k: (k, 0))

    kernel = functools.partial(_prop_matmul_kernel, tk=tk, scale=scale,
                               resident_e=resident_e)
    out, sum_out = pl.pallas_call(
        kernel,
        out_shape=(
            jax.ShapeDtypeStruct((M, Dp), jnp.bfloat16),   # next-layer E
            jax.ShapeDtypeStruct((M, Dp), jnp.float32),    # running sum
        ),
        grid=(M // tm, K // tk),
        in_specs=[
            pl.BlockSpec((tm, tk), lambda i, k: (i, k)),   # A tile (dominant stream)
            e_spec,                                         # E (resident or streamed)
            pl.BlockSpec((tm, Dp), lambda i, k: (i, 0)),   # previous running sum
        ],
        out_specs=(
            pl.BlockSpec((tm, Dp), lambda i, k: (i, 0)),
            pl.BlockSpec((tm, Dp), lambda i, k: (i, 0)),
        ),
        scratch_shapes=[pltpu.VMEM((tm, Dp), jnp.float32)],
        input_output_aliases={2: 1},                        # sum_in -> sum_out
        compiler_params=pltpu.CompilerParams(
            dimension_semantics=("parallel", "arbitrary"),
            vmem_limit_bytes=48 * 1024 * 1024,
        ),
    )(a_bf16, e_bf16, sum_in_f32)
    return out, sum_out


# ---------------------------------------------------------------------------
# Graph propagation + mean over layers (bipartite blocks; diag blocks of the
# LightGCN adjacency are zero, so each layer is two half-size matmuls).
#   all_emb_{l+1} = A @ all_emb_l ;  out = mean(all_emb_0 .. all_emb_L)
# Returns PADDED (lane-dense Dp, row-padded) user/item tables; padded rows are
# exact zeros and are never gathered.
# ---------------------------------------------------------------------------
def propagate(A_ui, A_iu, user_emb, item_emb, n_layer):
    n_user, D = user_emb.shape
    n_item = item_emb.shape[0]
    Dp = _round_up(D, 128)                  # lane-dense; zero columns are inert
    Nu = _round_up(n_user, 128)
    Ni = _round_up(n_item, 128)
    tu = _pick_tile(Nu)
    ti = _pick_tile(Ni)

    # Hoisted one-time pads / casts (shared by all 2*n_layer matmul calls).
    eu = jnp.pad(user_emb.astype(jnp.bfloat16), ((0, Nu - n_user), (0, Dp - D)))
    ei = jnp.pad(item_emb.astype(jnp.bfloat16), ((0, Ni - n_item), (0, Dp - D)))
    a_ui = jnp.pad(A_ui.astype(jnp.bfloat16), ((0, Nu - n_user), (0, Ni - n_item)))
    a_iu = jnp.pad(A_iu.astype(jnp.bfloat16), ((0, Ni - n_item), (0, Nu - n_user)))
    sum_u = jnp.pad(user_emb.astype(jnp.float32), ((0, Nu - n_user), (0, Dp - D)))
    sum_i = jnp.pad(item_emb.astype(jnp.float32), ((0, Ni - n_item), (0, Dp - D)))

    scale = 1.0 / float(n_layer + 1)        # folded into the last layer's epilogue
    for layer in range(n_layer):
        s = scale if layer == n_layer - 1 else 1.0
        eu_new, sum_u = prop_matmul(a_ui, ei, sum_u, tm=tu, tk=ti, scale=s)
        ei_new, sum_i = prop_matmul(a_iu, eu, sum_i, tm=ti, tk=tu, scale=s)
        eu, ei = eu_new, ei_new
    return sum_u, sum_i


# ---------------------------------------------------------------------------
# Kernel 2: batch-tiled BPR softplus loss
#   x = sum(u * (n - p), -1); loss = mean(softplus(x))
# ---------------------------------------------------------------------------
def _bpr_loss_kernel(u_ref, p_ref, n_ref, o_ref, acc_ref, *, batch, tb):
    i = pl.program_id(0)
    last = pl.num_programs(0) - 1

    @pl.when(i == 0)
    def _():
        acc_ref[0] = 0.0

    x = jnp.sum(u_ref[...] * (n_ref[...] - p_ref[...]), axis=1, keepdims=True)
    # numerically stable softplus
    sp = jnp.maximum(x, 0.0) + jnp.log(1.0 + jnp.exp(-jnp.abs(x)))

    @pl.when(i != last)
    def _():  # steady-state tiles: no padding rows, no mask work
        acc_ref[0] += jnp.sum(sp)

    @pl.when(i == last)
    def _():  # only the last tile may contain padding rows
        row = jax.lax.broadcasted_iota(jnp.int32, sp.shape, 0) + i * tb
        acc_ref[0] += jnp.sum(jnp.where(row < batch, sp, 0.0))
        o_ref[0, 0] = acc_ref[0] * (1.0 / float(batch))


def bpr_loss(user_e, pos_e, neg_e, *, tb=1024):
    B, Dp = user_e.shape
    assert Dp % 128 == 0
    tb = min(tb, _round_up(B, 8))
    Bp = _round_up(B, tb)
    pad = ((0, Bp - B), (0, 0))
    u = jnp.pad(user_e, pad)
    p = jnp.pad(pos_e, pad)
    n = jnp.pad(neg_e, pad)

    kernel = functools.partial(_bpr_loss_kernel, batch=B, tb=tb)
    out = pl.pallas_call(
        kernel,
        out_shape=jax.ShapeDtypeStruct((1, 1), jnp.float32),
        grid=(Bp // tb,),
        in_specs=[
            pl.BlockSpec((tb, Dp), lambda i: (i, 0)),
            pl.BlockSpec((tb, Dp), lambda i: (i, 0)),
            pl.BlockSpec((tb, Dp), lambda i: (i, 0)),
        ],
        out_specs=pl.BlockSpec(memory_space=pltpu.SMEM),
        scratch_shapes=[pltpu.SMEM((1,), jnp.float32)],
        compiler_params=pltpu.CompilerParams(
            dimension_semantics=("arbitrary",),
        ),
    )(u, p, n)
    return out[0, 0]


# ---------------------------------------------------------------------------
# Full forward (PRINTF.forward semantics, eval / no dropout)
# ---------------------------------------------------------------------------
def printf_forward(user, pos_item, neg_item, A, user_emb, item_emb, n_layer):
    n_user = user_emb.shape[0]
    # LightGCN adjacency: the [user,user] and [item,item] blocks are zero, so
    # only the two off-diagonal blocks are needed for A @ all_emb.
    A_ui = A[:n_user, n_user:]
    A_iu = A[n_user:, :n_user]
    u_emb, i_emb = propagate(A_ui, A_iu, user_emb, item_emb, n_layer)
    # Padded rows are zeros and never indexed by valid user/item ids.
    u = jnp.take(u_emb, user, axis=0)
    p = jnp.take(i_emb, pos_item, axis=0)
    n = jnp.take(i_emb, neg_item, axis=0)
    return bpr_loss(u, p, n)


# ---------------------------------------------------------------------------
# Pure-JAX reference for verification (dense A, full f32)
# ---------------------------------------------------------------------------
def printf_forward_ref(user, pos_item, neg_item, A, user_emb, item_emb, n_layer):
    n_user = user_emb.shape[0]
    all_emb = jnp.concatenate([user_emb, item_emb], axis=0)
    emb_list = [all_emb]
    e = all_emb
    for _ in range(n_layer):
        e = A @ e
        emb_list.append(e)
    all_emb_mean = jnp.mean(jnp.stack(emb_list), axis=0)
    u = all_emb_mean[:n_user][user]
    p = all_emb_mean[n_user:][pos_item]
    n = all_emb_mean[n_user:][neg_item]
    pos = jnp.sum(u * p, axis=1)
    neg = jnp.sum(u * n, axis=1)
    return jnp.mean(jax.nn.softplus(neg - pos))


if __name__ == "__main__":
    key = jax.random.PRNGKey(0)
    n_user, n_item, D = 24, 40, 32
    n_layer = 2
    batch = 20
    N = n_user + n_item

    k_u, k_i, k_adj, k_usr, k_pos, k_neg = jax.random.split(key, 6)

    # Deterministic "pretrained" embeddings (stand-ins for init_user_emb / init_item_emb).
    user_emb = jax.random.normal(k_u, (n_user, D), dtype=jnp.float32) * 0.1
    item_emb = jax.random.normal(k_i, (n_item, D), dtype=jnp.float32) * 0.1

    # Deterministic symmetric-normalized bipartite adjacency, densified to [N, N].
    inter = (jax.random.uniform(k_adj, (n_user, n_item)) < 0.4).astype(jnp.float32)
    adj = jnp.zeros((N, N), dtype=jnp.float32)
    adj = adj.at[:n_user, n_user:].set(inter)
    adj = adj.at[n_user:, :n_user].set(inter.T)
    deg = jnp.sum(adj, axis=1)
    d_inv_sqrt = jnp.where(deg > 0, 1.0 / jnp.sqrt(jnp.maximum(deg, 1e-12)), 0.0)
    A = adj * d_inv_sqrt[:, None] * d_inv_sqrt[None, :]

    # Batch of (user, pos_item, neg_item) indices.
    user = jax.random.randint(k_usr, (batch,), 0, n_user)
    pos_item = jax.random.randint(k_pos, (batch,), 0, n_item)
    neg_item = jax.random.randint(k_neg, (batch,), 0, n_item)

    fwd = jax.jit(functools.partial(printf_forward, n_layer=n_layer))
    loss = fwd(user, pos_item, neg_item, A, user_emb, item_emb)
    loss = jax.block_until_ready(loss)

    loss_ref = printf_forward_ref(user, pos_item, neg_item, A, user_emb, item_emb, n_layer)
    loss_ref = jax.block_until_ready(loss_ref)

    # bf16 A/E inputs on the MXU (f32 accumulation) -> slightly looser tolerance.
    assert jnp.allclose(loss, loss_ref, atol=5e-3, rtol=5e-3), (loss, loss_ref)
    print("KERNEL_OK")
</pallas_src>

<mosaic_0001>
module attributes {stable_mosaic.version = 11 : i64} {
  func.func @_prop_matmul_kernel(%arg0: i32, %arg1: i32, %arg2: memref<128x128xbf16, #tpu.memory_space<vmem>>, %arg3: memref<128x128xbf16, #tpu.memory_space<vmem>>, %arg4: memref<128x128xf32, #tpu.memory_space<vmem>>, %arg5: memref<128x128xbf16, #tpu.memory_space<vmem>>, %arg6: memref<128x128xf32, #tpu.memory_space<vmem>>, %arg7: memref<128x128xf32, #tpu.memory_space<vmem>>) attributes {dimension_semantics = [#tpu.dimension_semantics<parallel>, #tpu.dimension_semantics<arbitrary>], iteration_bounds = array<i64: 1, 1>, scalar_prefetch = 0 : i64, scratch_operands = 1 : i64, tpu.core_type = #tpu.core_type<tc>, window_params = [{transform_indices = @transform_0, window_bounds = array<i64: 128, 128>}, {pipeline_mode = #tpu.pipeline_mode<synchronous>, transform_indices = @transform_1, window_bounds = array<i64: 128, 128>}, {transform_indices = @transform_2, window_bounds = array<i64: 128, 128>}, {transform_indices = @transform_3, window_bounds = array<i64: 128, 128>}, {transform_indices = @transform_4, window_bounds = array<i64: 128, 128>}]} {
    %c0_i32 = arith.constant 0 : i32
    %0 = arith.cmpi eq, %arg1, %c0_i32 : i32
    %1 = arith.extui %0 : i1 to i32
    %c0_i32_0 = arith.constant 0 : i32
    %2 = arith.cmpi ne, %1, %c0_i32_0 : i32
    scf.if %2 {
      %cst_9 = arith.constant 0.000000e+00 : f32
      %15 = vector.broadcast %cst_9 : f32 to vector<128x128xf32>
      %c0_10 = arith.constant 0 : index
      %c0_11 = arith.constant 0 : index
      %16 = vector.load %arg7[%c0_10, %c0_11] : memref<128x128xf32, #tpu.memory_space<vmem>>, vector<128x128xf32>
      tpu.vector_store %arg7[%c0_10, %c0_11], %15 {strides = array<i32>} : memref<128x128xf32, #tpu.memory_space<vmem>>, vector<128x128xf32>,
    } else {
    }
    %c128_i32 = arith.constant 128 : i32
    %3 = arith.muli %arg1, %c128_i32 : i32
    %4 = tpu.assume_multiple %3, 128 : i32
    %5 = arith.index_cast %4 : i32 to index
    %c0 = arith.constant 0 : index
    %6 = vector.load %arg3[%5, %c0] : memref<128x128xbf16, #tpu.memory_space<vmem>>, vector<128x128xbf16>
    %c0_1 = arith.constant 0 : index
    %c0_2 = arith.constant 0 : index
    %7 = vector.load %arg7[%c0_1, %c0_2] : memref<128x128xf32, #tpu.memory_space<vmem>>, vector<128x128xf32>
    %c0_3 = arith.constant 0 : index
    %c0_4 = arith.constant 0 : index
    %8 = vector.load %arg2[%c0_3, %c0_4] : memref<128x128xbf16, #tpu.memory_space<vmem>>, vector<128x128xbf16>
    %cst = arith.constant dense<0.000000e+00> : vector<128x128xf32>
    %9 = tpu.matmul %8, %6, %cst {dimension_numbers = #tpu.dot_dimension_numbers<[1], [0], [0], [1], [0, 0, 1, 1], [], []>} : vector<128x128xbf16>, vector<128x128xbf16>, vector<128x128xf32> -> vector<128x128xf32>
    %10 = arith.addf %7, %9 : vector<128x128xf32>
    %c0_5 = arith.constant 0 : index
    %c0_6 = arith.constant 0 : index
    %11 = vector.load %arg7[%c0_5, %c0_6] : memref<128x128xf32, #tpu.memory_space<vmem>>, vector<128x128xf32>
    tpu.vector_store %arg7[%c0_5, %c0_6], %10 {strides = array<i32>} : memref<128x128xf32, #tpu.memory_space<vmem>>, vector<128x128xf32>,
    %c0_i32_7 = arith.constant 0 : i32
    %12 = arith.cmpi eq, %arg1, %c0_i32_7 : i32
    %13 = arith.extui %12 : i1 to i32
    %c0_i32_8 = arith.constant 0 : i32
    %14 = arith.cmpi ne, %13, %c0_i32_8 : i32
    scf.if %14 {
      %c0_9 = arith.constant 0 : index
      %c0_10 = arith.constant 0 : index
      %15 = vector.load %arg7[%c0_9, %c0_10] : memref<128x128xf32, #tpu.memory_space<vmem>>, vector<128x128xf32>
      %16 = arith.truncf %15 : vector<128x128xf32> to vector<128x128xbf16>
      %c0_11 = arith.constant 0 : index
      %c0_12 = arith.constant 0 : index
      %17 = vector.load %arg5[%c0_11, %c0_12] : memref<128x128xbf16, #tpu.memory_space<vmem>>, vector<128x128xbf16>
      tpu.vector_store %arg5[%c0_11, %c0_12], %16 {strides = array<i32>} : memref<128x128xbf16, #tpu.memory_space<vmem>>, vector<128x128xbf16>,
      %c0_13 = arith.constant 0 : index
      %c0_14 = arith.constant 0 : index
      %18 = vector.load %arg4[%c0_13, %c0_14] : memref<128x128xf32, #tpu.memory_space<vmem>>, vector<128x128xf32>
      %19 = arith.addf %18, %15 : vector<128x128xf32>
      %cst_15 = arith.constant 1.000000e+00 : f32
      %20 = vector.broadcast %cst_15 : f32 to vector<128x128xf32>
      %21 = arith.mulf %19, %20 : vector<128x128xf32>
      %c0_16 = arith.constant 0 : index
      %c0_17 = arith.constant 0 : index
      %22 = vector.load %arg6[%c0_16, %c0_17] : memref<128x128xf32, #tpu.memory_space<vmem>>, vector<128x128xf32>
      tpu.vector_store %arg6[%c0_16, %c0_17], %21 {strides = array<i32>} : memref<128x128xf32, #tpu.memory_space<vmem>>, vector<128x128xf32>,
    } else {
    }
    return
  }
  func.func @transform_0(%arg0: i32, %arg1: i32) -> (i32, i32) {
    %c0_i32 = arith.constant 0 : i32
    return %arg0, %arg1 : i32, i32
  }
  func.func @transform_1(%arg0: i32, %arg1: i32) -> (i32, i32) {
    %c0_i32 = arith.constant 0 : i32
    %c0_i32_0 = arith.constant 0 : i32
    %c0_i32_1 = arith.constant 0 : i32
    return %c0_i32, %c0_i32_0 : i32, i32
  }
  func.func @transform_2(%arg0: i32, %arg1: i32) -> (i32, i32) {
    %c0_i32 = arith.constant 0 : i32
    %c0_i32_0 = arith.constant 0 : i32
    return %arg0, %c0_i32 : i32, i32
  }
  func.func @transform_3(%arg0: i32, %arg1: i32) -> (i32, i32) {
    %c0_i32 = arith.constant 0 : i32
    %c0_i32_0 = arith.constant 0 : i32
    return %arg0, %c0_i32 : i32, i32
  }
  func.func @transform_4(%arg0: i32, %arg1: i32) -> (i32, i32) {
    %c0_i32 = arith.constant 0 : i32
    %c0_i32_0 = arith.constant 0 : i32
    return %arg0, %c0_i32 : i32, i32
  }
}

module attributes {stable_mosaic.version = 11 : i64} {
  func.func @_prop_matmul_kernel(%arg0: i32, %arg1: i32, %arg2: memref<128x128xbf16, #tpu.memory_space<vmem>>, %arg3: memref<128x128xbf16, #tpu.memory_space<vmem>>, %arg4: memref<128x128xf32, #tpu.memory_space<vmem>>, %arg5: memref<128x128xbf16, #tpu.memory_space<vmem>>, %arg6: memref<128x128xf32, #tpu.memory_space<vmem>>, %arg7: memref<128x128xf32, #tpu.memory_space<vmem>>) attributes {dimension_semantics = [#tpu.dimension_semantics<parallel>, #tpu.dimension_semantics<arbitrary>], iteration_bounds = array<i64: 1, 1>, scalar_prefetch = 0 : i64, scratch_operands = 1 : i64, tpu.core_type = #tpu.core_type<tc>, window_params = [{transform_indices = @transform_0, window_bounds = array<i64: 128, 128>}, {pipeline_mode = #tpu.pipeline_mode<synchronous>, transform_indices = @transform_1, window_bounds = array<i64: 128, 128>}, {transform_indices = @transform_2, window_bounds = array<i64: 128, 128>}, {transform_indices = @transform_3, window_bounds = array<i64: 128, 128>}, {transform_indices = @transform_4, window_bounds = array<i64: 128, 128>}]} {
    %c0_i32 = arith.constant 0 : i32
    %0 = arith.cmpi eq, %arg1, %c0_i32 : i32
    %1 = arith.extui %0 : i1 to i32
    %c0_i32_0 = arith.constant 0 : i32
    %2 = arith.cmpi ne, %1, %c0_i32_0 : i32
    scf.if %2 {
      %cst_9 = arith.constant 0.000000e+00 : f32
      %15 = vector.broadcast %cst_9 : f32 to vector<128x128xf32>
      %c0_10 = arith.constant 0 : index
      %c0_11 = arith.constant 0 : index
      %16 = vector.load %arg7[%c0_10, %c0_11] : memref<128x128xf32, #tpu.memory_space<vmem>>, vector<128x128xf32>
      tpu.vector_store %arg7[%c0_10, %c0_11], %15 {strides = array<i32>} : memref<128x128xf32, #tpu.memory_space<vmem>>, vector<128x128xf32>,
    } else {
    }
    %c128_i32 = arith.constant 128 : i32
    %3 = arith.muli %arg1, %c128_i32 : i32
    %4 = tpu.assume_multiple %3, 128 : i32
    %5 = arith.index_cast %4 : i32 to index
    %c0 = arith.constant 0 : index
    %6 = vector.load %arg3[%5, %c0] : memref<128x128xbf16, #tpu.memory_space<vmem>>, vector<128x128xbf16>
    %c0_1 = arith.constant 0 : index
    %c0_2 = arith.constant 0 : index
    %7 = vector.load %arg7[%c0_1, %c0_2] : memref<128x128xf32, #tpu.memory_space<vmem>>, vector<128x128xf32>
    %c0_3 = arith.constant 0 : index
    %c0_4 = arith.constant 0 : index
    %8 = vector.load %arg2[%c0_3, %c0_4] : memref<128x128xbf16, #tpu.memory_space<vmem>>, vector<128x128xbf16>
    %cst = arith.constant dense<0.000000e+00> : vector<128x128xf32>
    %9 = tpu.matmul %8, %6, %cst {dimension_numbers = #tpu.dot_dimension_numbers<[1], [0], [0], [1], [0, 0, 1, 1], [], []>} : vector<128x128xbf16>, vector<128x128xbf16>, vector<128x128xf32> -> vector<128x128xf32>
    %10 = arith.addf %7, %9 : vector<128x128xf32>
    %c0_5 = arith.constant 0 : index
    %c0_6 = arith.constant 0 : index
    %11 = vector.load %arg7[%c0_5, %c0_6] : memref<128x128xf32, #tpu.memory_space<vmem>>, vector<128x128xf32>
    tpu.vector_store %arg7[%c0_5, %c0_6], %10 {strides = array<i32>} : memref<128x128xf32, #tpu.memory_space<vmem>>, vector<128x128xf32>,
    %c0_i32_7 = arith.constant 0 : i32
    %12 = arith.cmpi eq, %arg1, %c0_i32_7 : i32
    %13 = arith.extui %12 : i1 to i32
    %c0_i32_8 = arith.constant 0 : i32
    %14 = arith.cmpi ne, %13, %c0_i32_8 : i32
    scf.if %14 {
      %c0_9 = arith.constant 0 : index
      %c0_10 = arith.constant 0 : index
      %15 = vector.load %arg7[%c0_9, %c0_10] : memref<128x128xf32, #tpu.memory_space<vmem>>, vector<128x128xf32>
      %16 = arith.truncf %15 : vector<128x128xf32> to vector<128x128xbf16>
      %c0_11 = arith.constant 0 : index
      %c0_12 = arith.constant 0 : index
      %17 = vector.load %arg5[%c0_11, %c0_12] : memref<128x128xbf16, #tpu.memory_space<vmem>>, vector<128x128xbf16>
      tpu.vector_store %arg5[%c0_11, %c0_12], %16 {strides = array<i32>} : memref<128x128xbf16, #tpu.memory_space<vmem>>, vector<128x128xbf16>,
      %c0_13 = arith.constant 0 : index
      %c0_14 = arith.constant 0 : index
      %18 = vector.load %arg4[%c0_13, %c0_14] : memref<128x128xf32, #tpu.memory_space<vmem>>, vector<128x128xf32>
      %19 = arith.addf %18, %15 : vector<128x128xf32>
      %cst_15 = arith.constant 0.333333343 : f32
      %20 = vector.broadcast %cst_15 : f32 to vector<128x128xf32>
      %21 = arith.mulf %19, %20 : vector<128x128xf32>
      %c0_16 = arith.constant 0 : index
      %c0_17 = arith.constant 0 : index
      %22 = vector.load %arg6[%c0_16, %c0_17] : memref<128x128xf32, #tpu.memory_space<vmem>>, vector<128x128xf32>
      tpu.vector_store %arg6[%c0_16, %c0_17], %21 {strides = array<i32>} : memref<128x128xf32, #tpu.memory_space<vmem>>, vector<128x128xf32>,
    } else {
    }
    return
  }
  func.func @transform_0(%arg0: i32, %arg1: i32) -> (i32, i32) {
    %c0_i32 = arith.constant 0 : i32
    return %arg0, %arg1 : i32, i32
  }
  func.func @transform_1(%arg0: i32, %arg1: i32) -> (i32, i32) {
    %c0_i32 = arith.constant 0 : i32
    %c0_i32_0 = arith.constant 0 : i32
    %c0_i32_1 = arith.constant 0 : i32
    return %c0_i32, %c0_i32_0 : i32, i32
  }
  func.func @transform_2(%arg0: i32, %arg1: i32) -> (i32, i32) {
    %c0_i32 = arith.constant 0 : i32
    %c0_i32_0 = arith.constant 0 : i32
    return %arg0, %c0_i32 : i32, i32
  }
  func.func @transform_3(%arg0: i32, %arg1: i32) -> (i32, i32) {
    %c0_i32 = arith.constant 0 : i32
    %c0_i32_0 = arith.constant 0 : i32
    return %arg0, %c0_i32 : i32, i32
  }
  func.func @transform_4(%arg0: i32, %arg1: i32) -> (i32, i32) {
    %c0_i32 = arith.constant 0 : i32
    %c0_i32_0 = arith.constant 0 : i32
    return %arg0, %c0_i32 : i32, i32
  }
}

module attributes {stable_mosaic.version = 11 : i64} {
  func.func @_bpr_loss_kernel(%arg0: i32, %arg1: memref<24x128xf32, #tpu.memory_space<vmem>>, %arg2: memref<24x128xf32, #tpu.memory_space<vmem>>, %arg3: memref<24x128xf32, #tpu.memory_space<vmem>>, %arg4: memref<1x1xf32, #tpu.memory_space<smem>>, %arg5: memref<1xf32, #tpu.memory_space<smem>>) attributes {dimension_semantics = [#tpu.dimension_semantics<arbitrary>], iteration_bounds = array<i64: 1>, scalar_prefetch = 0 : i64, scratch_operands = 1 : i64, tpu.core_type = #tpu.core_type<tc>, window_params = [{transform_indices = @transform_0, window_bounds = array<i64: 24, 128>}, {transform_indices = @transform_1, window_bounds = array<i64: 24, 128>}, {transform_indices = @transform_2, window_bounds = array<i64: 24, 128>}, {transform_indices = @transform_3, window_bounds = array<i64: 1, 1>}]} {
    %c0_i32 = arith.constant 0 : i32
    %0 = arith.cmpi eq, %arg0, %c0_i32 : i32
    %1 = arith.extui %0 : i1 to i32
    %c0_i32_0 = arith.constant 0 : i32
    %2 = arith.cmpi ne, %1, %c0_i32_0 : i32
    scf.if %2 {
      %cst_13 = arith.constant 0.000000e+00 : f32
      %c0_14 = arith.constant 0 : index
      %26 = memref.load %arg5[%c0_14] : memref<1xf32, #tpu.memory_space<smem>>
      memref.store %cst_13, %arg5[%c0_14] : memref<1xf32, #tpu.memory_space<smem>>
    } else {
    }
    %c0 = arith.constant 0 : index
    %c0_1 = arith.constant 0 : index
    %3 = vector.load %arg1[%c0, %c0_1] : memref<24x128xf32, #tpu.memory_space<vmem>>, vector<24x128xf32>
    %c0_2 = arith.constant 0 : index
    %c0_3 = arith.constant 0 : index
    %4 = vector.load %arg3[%c0_2, %c0_3] : memref<24x128xf32, #tpu.memory_space<vmem>>, vector<24x128xf32>
    %c0_4 = arith.constant 0 : index
    %c0_5 = arith.constant 0 : index
    %5 = vector.load %arg2[%c0_4, %c0_5] : memref<24x128xf32, #tpu.memory_space<vmem>>, vector<24x128xf32>
    %6 = arith.subf %4, %5 : vector<24x128xf32>
    %7 = arith.mulf %3, %6 : vector<24x128xf32>
    %cst = arith.constant dense<0.000000e+00> : vector<24xf32>
    %8 = vector.multi_reduction <add>, %7, %cst [1] : vector<24x128xf32> to vector<24xf32>
    %9 = vector.shape_cast %8 : vector<24xf32> to vector<24x1xf32>
    %cst_6 = arith.constant 0.000000e+00 : f32
    %10 = vector.broadcast %cst_6 : f32 to vector<24x1xf32>
    %11 = arith.maximumf %9, %10 : vector<24x1xf32>
    %12 = math.absf %9 : vector<24x1xf32>
    %cst_7 = arith.constant 0.000000e+00 : f32
    %13 = vector.broadcast %cst_7 : f32 to vector<24x1xf32>
    %14 = arith.subf %13, %12 : vector<24x1xf32>
    %15 = math.exp %14 : vector<24x1xf32>
    %cst_8 = arith.constant 1.000000e+00 : f32
    %16 = vector.broadcast %cst_8 : f32 to vector<24x1xf32>
    %17 = arith.addf %16, %15 : vector<24x1xf32>
    %18 = math.log %17 : vector<24x1xf32>
    %19 = arith.addf %11, %18 : vector<24x1xf32>
    %c0_i32_9 = arith.constant 0 : i32
    %20 = arith.cmpi ne, %arg0, %c0_i32_9 : i32
    %21 = arith.extui %20 : i1 to i32
    %c0_i32_10 = arith.constant 0 : i32
    %22 = arith.cmpi ne, %21, %c0_i32_10 : i32
    scf.if %22 {
      %c0_13 = arith.constant 0 : index
      %26 = memref.load %arg5[%c0_13] : memref<1xf32, #tpu.memory_space<smem>>
      %27 = vector.shape_cast %19 : vector<24x1xf32> to vector<1x24x1xf32>
      %cst_14 = arith.constant dense<0.000000e+00> : vector<1xf32>
      %28 = vector.multi_reduction <add>, %27, %cst_14 [1, 2] : vector<1x24x1xf32> to vector<1xf32>
      %29 = vector.shape_cast %28 : vector<1xf32> to vector<1x1x1xf32>
      %30 = vector.extract %29[0, 0, 0] : f32 from vector<1x1x1xf32>
      %31 = arith.addf %26, %30 : f32
      %c0_15 = arith.constant 0 : index
      %32 = memref.load %arg5[%c0_15] : memref<1xf32, #tpu.memory_space<smem>>
      memref.store %31, %arg5[%c0_15] : memref<1xf32, #tpu.memory_space<smem>>
    } else {
    }
    %c0_i32_11 = arith.constant 0 : i32
    %23 = arith.cmpi eq, %arg0, %c0_i32_11 : i32
    %24 = arith.extui %23 : i1 to i32
    %c0_i32_12 = arith.constant 0 : i32
    %25 = arith.cmpi ne, %24, %c0_i32_12 : i32
    scf.if %25 {
      %26 = tpu.iota {dimensions = array<i32: 0>} : vector<24x1xi32>
      %c24_i32 = arith.constant 24 : i32
      %27 = arith.muli %arg0, %c24_i32 : i32
      %28 = vector.broadcast %27 : i32 to vector<24x1xi32>
      %29 = arith.addi %26, %28 : vector<24x1xi32>
      %c0_13 = arith.constant 0 : index
      %30 = memref.load %arg5[%c0_13] : memref<1xf32, #tpu.memory_space<smem>>
      %c20_i32 = arith.constant 20 : i32
      %31 = vector.broadcast %c20_i32 : i32 to vector<24x1xi32>
      %32 = arith.cmpi slt, %29, %31 : vector<24x1xi32>
      %cst_14 = arith.constant 0.000000e+00 : f32
      %33 = vector.broadcast %cst_14 : f32 to vector<24x1xf32>
      %34 = arith.select %32, %19, %33 : vector<24x1xi1>, vector<24x1xf32>
      %35 = vector.shape_cast %34 : vector<24x1xf32> to vector<1x24x1xf32>
      %cst_15 = arith.constant dense<0.000000e+00> : vector<1xf32>
      %36 = vector.multi_reduction <add>, %35, %cst_15 [1, 2] : vector<1x24x1xf32> to vector<1xf32>
      %37 = vector.shape_cast %36 : vector<1xf32> to vector<1x1x1xf32>
      %38 = vector.extract %37[0, 0, 0] : f32 from vector<1x1x1xf32>
      %39 = arith.addf %30, %38 : f32
      %c0_16 = arith.constant 0 : index
      %40 = memref.load %arg5[%c0_16] : memref<1xf32, #tpu.memory_space<smem>>
      memref.store %39, %arg5[%c0_16] : memref<1xf32, #tpu.memory_space<smem>>
      %c0_17 = arith.constant 0 : index
      %41 = memref.load %arg5[%c0_17] : memref<1xf32, #tpu.memory_space<smem>>
      %cst_18 = arith.constant 5.000000e-02 : f32
      %42 = arith.mulf %41, %cst_18 : f32
      %c0_19 = arith.constant 0 : index
      %c0_20 = arith.constant 0 : index
      %43 = memref.load %arg4[%c0_19, %c0_20] : memref<1x1xf32, #tpu.memory_space<smem>>
      memref.store %42, %arg4[%c0_19, %c0_20] : memref<1x1xf32, #tpu.memory_space<smem>>
    } else {
    }
    return
  }
  func.func @transform_0(%arg0: i32) -> (i32, i32) {
    %c0_i32 = arith.constant 0 : i32
    %c0_i32_0 = arith.constant 0 : i32
    return %arg0, %c0_i32 : i32, i32
  }
  func.func @transform_1(%arg0: i32) -> (i32, i32) {
    %c0_i32 = arith.constant 0 : i32
    %c0_i32_0 = arith.constant 0 : i32
    return %arg0, %c0_i32 : i32, i32
  }
  func.func @transform_2(%arg0: i32) -> (i32, i32) {
    %c0_i32 = arith.constant 0 : i32
    %c0_i32_0 = arith.constant 0 : i32
    return %arg0, %c0_i32 : i32, i32
  }
  func.func @transform_3(%arg0: i32) -> (i32, i32) {
    %c0_i32 = arith.constant 0 : i32
    %c0_i32_0 = arith.constant 0 : i32
    %c0_i32_1 = arith.constant 0 : i32
    return %c0_i32, %c0_i32_0 : i32, i32
  }
}

</mosaic_0001>

<bundles_post_ra>
// kernel: printf_forward.9
= control target key start
LH: loop header
LB: loop body
LE: loop exit
PB: predicated region body
PF: predicated region fallthrough
CT: control target
= control target key end

     0   :  { %s233_s0 = inlined_call_operand.vmem [shape: f32[24,128], index: 0, kind: input, shape index: {}]   ;;  %s234_s1 = inlined_call_operand.vmem [shape: f32[24,128], index: 1, kind: input, shape index: {}]   ;;  %s235_s2 = inlined_call_operand.vmem [shape: f32[24,128], index: 2, kind: input, shape index: {}]   ;;  %s236_s3 = inlined_call_operand.hbm [shape: f32[1,1], index: 3, kind: output, shape index: {}]  }
   0x1   :  { %v23_v0 = vld [vmem:[%s233_s0 + $0x10] sm:$0xff]  ;;  %v21_v4 = vld [vmem:[%s233_s0] sm:$0xff]  ;;  %v25_v8 = vld [vmem:[%s235_s2 + $0x8] sm:$0xff] }
   0x2   :  { %v26_v1 = vld [vmem:[%s235_s2 + $0x10] sm:$0xff]  ;;  %v24_v5 = vld [vmem:[%s235_s2] sm:$0xff]  ;;  %v28_v9 = vld [vmem:[%s234_s1 + $0x8] sm:$0xff] }
   0x3   :  { %v29_v2 = vld [vmem:[%s234_s1 + $0x10] sm:$0xff]  ;;  %v27_v6 = vld [vmem:[%s234_s1] sm:$0xff]  ;;  %v22_v11 = vld [vmem:[%s233_s0 + $0x8] sm:$0xff]  ;;  %v31_v12 = vsub.f32 %v25_v8, %v28_v9 }
   0x4   :  { %v32_v3 = vsub.f32 %v26_v1, %v29_v2  ;;  %v30_v7 = vsub.f32 %v24_v5, %v27_v6 }
   0x6   :  { %v35_v10 = vmul.f32 %v32_v3, %v23_v0 }
   0x7   :  { %8 = vsyncpa [#allocation4], 0  ;;  %v33_v13 = vmul.f32 %v30_v7, %v21_v4  ;;  %v34_v14 = vmul.f32 %v31_v12, %v22_v11  ;;  %v95_v33 = vlaneseq  ;;  %vm111_vm1 = vcmask 7168   ;;  %s161_s4 = scalar_lea.hbm %s236_s3, 16 }
   0x8   :  { %40 = vadd.xlane.f32.xlu1 %v35_v10  ;;  %p162_p0 = scmp.ne.s32.totalorder %s236_s3, %s161_s4  ;;  %p165_p1 = scmp.lt.u32.totalorder %s161_s4, %s236_s3 }
   0x9   :  { %36 = vadd.xlane.f32.xlu0 %v33_v13  ;;  %v96_v34 = vshrl.u32 %v95_v33, 7 }
   0xa   :  { %p167_p2 = pnand %p165_p1, %p162_p0 }
   0xb   :  { %v98_v39 = vadd.s32 16, %v96_v34 }
   0xd   :  { %38 = vadd.xlane.f32.xlu0 %v34_v14  ;;  %vm107_vm0 = vcmp.lt.s32.totalorder %v98_v39, 20 }
  0x95   :  { %v41_v15 = vpop.xlane.xlu1 %40 }
  0x96   :  { %v47_v16 = vand.u32 2147483647, %v41_v15  ;;  %v37_v17 = vpop.xlane.xlu0 %36  ;;  %v44_v40 = vmax.f32 %v41_v15, 0.0 }
  0x97   :  { %v45_v18 = vand.u32 2147483647, %v37_v17  ;;  %v42_v41 = vmax.f32 %v37_v17, 0.0 }
  0x98   :  { %v50_v19 = vsub.f32 0.0, %v47_v16 }
  0x99   :  { %v48_v20 = vsub.f32 0.0, %v45_v18 }
  0x9a   :  { %v55_v21 = vmul.f32 1.442695, %v50_v19  ;;  %v39_v22 = vpop.xlane.xlu0 %38 }
  0x9b   :  { %v51_v23 = vmul.f32 1.442695, %v48_v20  ;;  %v46_v24 = vand.u32 2147483647, %v39_v22  ;;  %v43_v45 = vmax.f32 %v39_v22, 0.0 }
  0x9c   :  { %149 = vpow2.f32 %v55_v21 }
  0x9d   :  { %151 = vpow2.f32 %v51_v23  ;;  %v49_v25 = vsub.f32 0.0, %v46_v24 }
  0x9f   :  { %v53_v26 = vmul.f32 1.442695, %v49_v25 }
  0xa1   :  { %153 = vpow2.f32 %v53_v26 }
  0xa6   :  { %v150_v27 = vpop.eup %149 }
  0xa7   :  { %v152_v28 = vpop.eup %151  ;;  %v59_v29 = vadd.f32 1.0, %v150_v27 }
  0xa8   :  { %v57_v30 = vadd.f32 1.0, %v152_v28 }
  0xa9   :  { %155 = vlog2.f32 %v59_v29 }
  0xaa   :  { %157 = vlog2.f32 %v57_v30 }
  0xab   :  { %v154_v31 = vpop.eup %153 }
  0xac   :  { %v58_v32 = vadd.f32 1.0, %v154_v31 }
  0xae   :  { %159 = vlog2.f32 %v58_v32 }
  0xb3   :  { %v156_v35 = vpop.eup %155 }
  0xb4   :  { %v158_v36 = vpop.eup %157  ;;  %v65_v37 = vmul.f32 0.6931472, %v156_v35 }
  0xb5   :  { %v61_v38 = vmul.f32 0.6931472, %v158_v36 }
  0xb6   :  { %v68_v43 = vadd.f32 %v65_v37, %v44_v40 }
  0xb7   :  { %v66_v44 = vadd.f32 %v61_v38, %v42_v41 }
  0xb8   :  { %v160_v42 = vpop.eup %159  ;;  %v110_v48 = vsel %vm107_vm0, %v68_v43, 0.0 }
  0xb9   :  { %v63_v46 = vmul.f32 0.6931472, %v160_v42  ;;  %v112_v49 = vsel %vm111_vm1, %v66_v44, 0.0  ;;  %v115_v52 = vsel %vm111_vm1, %v110_v48, 0.0 }
  0xbb   :  { %v67_v47 = vadd.f32 %v63_v46, %v43_v45 }
  0xbd   :  { %v113_v50 = vsel %vm111_vm1, %v67_v47, 0.0 }
  0xbe   :  { %v114_v51 = vadd.f32 %v113_v50, %v112_v49 }
  0xc0   :  { %v116_v53 = vadd.f32 %v115_v52, %v114_v51 }
  0xc2   :  { %117 = vadd.xlane.f32.xlu1 %v116_v53 }
 0x14f   :  { %v118_v54 = vpop.xlane.xlu1 %117 }
 0x150   :  { %v119_v55 = vrot.slane %v118_v54, 4 }
 0x152   :  { %v120_v56 = vadd.f32 %v119_v55, %v118_v54 }
 0x154   :  { %v121_v57 = vrot.slane %v120_v56, 2 }
 0x156   :  { %v122_v58 = vadd.f32 %v121_v57, %v120_v56 }
 0x158   :  { %v123_v59 = vrot.slane %v122_v58, 1 }
 0x15a   :  { %v124_v60 = vadd.f32 %v123_v59, %v122_v58 }
 0x15c   :  { %146 = vpush %v124_v60 }
 0x18d   :  { %s147_s0 = spop %146 }
 0x18e   :  { %s130_s1 = smul.f32 0.05, %s147_s0 }
 0x190   :  { %132 = sst [smem:[#allocation3]] %s130_s1 }
 0x191   :  { %170 = shalt.err (!%p167_p2)
}
 0x192   :  { %s173_s9 = smov [#allocation3]  }
 0x193   :  { %140 = dma.smem_to_hbm %s173_s9, 16, %s236_s3, [#allocation4]  }
 0x194   :  { %171 = dma.done.wait [#allocation4], 16  }
 0x195   :  { %172 = vsyncadd [#allocation4], 4294967280 }
 0x196   :  { %144 = sfence }
 0x197   :  { %145 = vsyncpa [#allocation4], 1 }

// kernel: printf_forward.8
= control target key start
LH: loop header
LB: loop body
LE: loop exit
PB: predicated region body
PF: predicated region fallthrough
CT: control target
= control target key end

     0   :  { %s894_s0 = inlined_call_operand.vmem [shape: bf16[128,128], index: 0, kind: input, shape index: {}]   ;;  %s895_s1 = inlined_call_operand.vmem [shape: bf16[128,128], index: 1, kind: input, shape index: {}]   ;;  %s896_s2 = inlined_call_operand.vmem [shape: f32[128,128], index: 2, kind: input, shape index: {}, may-alias: {2,4}]   ;;  %s897_s3 = inlined_call_operand.hbm [shape: bf16[128,128], index: 3, kind: output, shape index: {0}]   ;;  %s898_s4 = inlined_call_operand.vmem [shape: f32[128,128], index: 4, kind: output, shape index: {1}, may-alias: {2,4}]  }
   0x1   :  { %v663_v0 = vld [vmem:[%s895_s1] sm:$0xff]   ;;  %v664_v1 = vld [vmem:[%s895_s1 + $0x8] sm:$0xff]   ;;  %v665_v2 = vld [vmem:[%s895_s1 + $0x10] sm:$0xff]  }
   0x2   :  { %612 = vmatprep.subr.bf16.mxu0 %v663_v0  ;;  %644 = vmatprep.subr.bf16.mxu1 %v663_v0  ;;  %v666_v3 = vld [vmem:[%s895_s1 + $0x18] sm:$0xff]   ;;  %v671_v4 = vld [vmem:[%s894_s0] sm:$0xff]   ;;  %v668_v7 = vld [vmem:[%s895_s1 + $0x28] sm:$0xff]  }
   0x3   :  { %613 = vmatpush3.bf16.msra.mxu0 %v663_v0  ;;  %652 = vmatpush3.bf16.msra.mxu1 %v663_v0  ;;  %v672_v5 = vld [vmem:[%s894_s0 + $0x20] sm:$0xff]  }
   0x4   :  { %614 = vmatprep.subr.bf16.mxu0 %v664_v1  ;;  %645 = vmatprep.subr.bf16.mxu1 %v664_v1  ;;  %v667_v6 = vld [vmem:[%s895_s1 + $0x20] sm:$0xff]  }
   0x5   :  { %628 = vmatprep.mubr.bf16.mxu0 %v671_v4  ;;  %636 = vmatprep.mubr.bf16.mxu1 %v672_v5 }
   0x7   :  { %615 = vmatpush3.bf16.msra.mxu0 %v664_v1  ;;  %653 = vmatpush3.bf16.msra.mxu1 %v664_v1 }
   0x8   :  { %616 = vmatprep.subr.bf16.mxu0 %v665_v2  ;;  %646 = vmatprep.subr.bf16.mxu1 %v665_v2 }
   0xb   :  { %617 = vmatpush3.bf16.msra.mxu0 %v665_v2  ;;  %654 = vmatpush3.bf16.msra.mxu1 %v665_v2 }
   0xc   :  { %618 = vmatprep.subr.bf16.mxu0 %v666_v3  ;;  %647 = vmatprep.subr.bf16.mxu1 %v666_v3 }
   0xf   :  { %619 = vmatpush3.bf16.msra.mxu0 %v666_v3  ;;  %655 = vmatpush3.bf16.msra.mxu1 %v666_v3 }
  0x10   :  { %620 = vmatprep.subr.bf16.mxu0 %v667_v6  ;;  %648 = vmatprep.subr.bf16.mxu1 %v667_v6 }
  0x11   :  { %10 = vsyncpa [#allocation4], 0  ;;  %v669_v8 = vld [vmem:[%s895_s1 + $0x30] sm:$0xff]   ;;  %v670_v9 = vld [vmem:[%s895_s1 + $0x38] sm:$0xff]   ;;  %s703_s7 = smov [#allocation3]  }
  0x12   :  { %v673_v10 = vld [vmem:[%s894_s0 + $0x8] sm:$0xff]   ;;  %v675_v12 = vld [vmem:[%s894_s0 + $0x10] sm:$0xff]   ;;  %v677_v14 = vld [vmem:[%s894_s0 + $0x18] sm:$0xff]   ;;  %s484_s8 = sshll.u32 %s703_s7, 4  ;;  %s851_s8 = int_to_ptr.vmem [resolvable:$true] %s484_s8 }
  0x13   :  { %621 = vmatpush3.bf16.msra.mxu0 %v667_v6  ;;  %656 = vmatpush3.bf16.msra.mxu1 %v667_v6  ;;  %v674_v11 = vld [vmem:[%s894_s0 + $0x28] sm:$0xff]   ;;  %v676_v13 = vld [vmem:[%s894_s0 + $0x30] sm:$0xff]   ;;  %v678_v15 = vld [vmem:[%s894_s0 + $0x38] sm:$0xff]   ;;  %s679_s25 = scalar_lea.vmem %s851_s8, 1024  ;;  %p684_p1 = scmp.lt.s32.totalorder %s851_s8, %s851_s8 }
  0x14   :  { %622 = vmatprep.subr.bf16.mxu0 %v668_v7  ;;  %649 = vmatprep.subr.bf16.mxu1 %v668_v7  ;;  %v417_v16 = vld [vmem:[%s896_s2 + $0x10] sm:$0xff]  ;;  %v415_v18 = vld [vmem:[%s896_s2] sm:$0xff]  ;;  %v418_v22 = vld [vmem:[%s896_s2 + $0x18] sm:$0xff]  ;;  %p680_p0 = scmp.ne.s32.totalorder %s851_s8, %s679_s25  ;;  %p685_p2 = scmp.lt.s32.totalorder %s679_s25, %s679_s25 }
  0x15   :  { %v425_v17 = vld [vmem:[%s896_s2 + $0x50] sm:$0xff]  ;;  %v423_v19 = vld [vmem:[%s896_s2 + $0x40] sm:$0xff]  ;;  %v426_v27 = vld [vmem:[%s896_s2 + $0x58] sm:$0xff] }
  0x16   :  { %v416_v32 = vld [vmem:[%s896_s2 + $0x8] sm:$0xff]  ;;  %p686_p3 = por %p685_p2, %p684_p1 }
  0x17   :  { %623 = vmatpush3.bf16.msra.mxu0 %v668_v7  ;;  %657 = vmatpush3.bf16.msra.mxu1 %v668_v7  ;;  %v424_v33 = vld [vmem:[%s896_s2 + $0x48] sm:$0xff] }
  0x18   :  { %624 = vmatprep.subr.bf16.mxu0 %v669_v8  ;;  %650 = vmatprep.subr.bf16.mxu1 %v669_v8  ;;  %p687_p4 = pnand %p686_p3, %p680_p0 }
  0x1b   :  { %625 = vmatpush3.bf16.msra.mxu0 %v669_v8  ;;  %658 = vmatpush3.bf16.msra.mxu1 %v669_v8 }
  0x1c   :  { %626 = vmatprep.subr.bf16.mxu0 %v670_v9  ;;  %651 = vmatprep.subr.bf16.mxu1 %v670_v9 }
  0x1f   :  { %627 = vmatpush3.bf16.msra.mxu0 %v670_v9  ;;  %659 = vmatpush3.bf16.msra.mxu1 %v670_v9 }
  0x22   :  { %629 = vmatmul.mubr.bf16.vlgmr.msra.gmra.mrb[0].mxu0 %v673_v10  ;;  %637 = vmatmul.mubr.bf16.vlgmr.msra.gmra.mrb[0].mxu1 %v674_v11 }
  0x23   :  { %632 = vmatprep.mubr.bf16.mxu0 %v675_v12  ;;  %640 = vmatprep.mubr.bf16.mxu1 %v676_v13 }
  0x2a   :  { %633 = vmatmul.mubr.bf16.gmra.mrb[4].mxu0 %v677_v14  ;;  %641 = vmatmul.mubr.bf16.gmra.mrb[4].mxu1 %v678_v15 }
  0xf5   :  { %v630_v20 = vpop.f32.mrb[0].mxu0  ;;  %v638_v21 = vpop.f32.mrb[0].mxu1 }
  0xf6   :  { %v433_v23 = vadd.f32 %v630_v20, %v417_v16  ;;  %v441_v24 = vadd.f32 %v638_v21, %v425_v17  ;;  %v221_v25 = vpop.f32.mrb[1].mxu0  ;;  %v253_v26 = vpop.f32.mrb[1].mxu1 }
  0xf7   :  { %v431_v28 = vadd.f32 %v415_v18, %v221_v25  ;;  %v439_v29 = vadd.f32 %v423_v19, %v253_v26  ;;  %v631_v30 = vpop.f32.mrb[2].mxu0  ;;  %v639_v31 = vpop.f32.mrb[2].mxu1 }
  0xf8   :  { %v449_v34 = vmul.f32 0.33333334, %v433_v23  ;;  %v457_v35 = vmul.f32 0.33333334, %v441_v24  ;;  %v557_v36 = vpack.c.bf16 %v631_v30, %v630_v20  ;;  %v434_v37 = vadd.f32 %v631_v30, %v418_v22  ;;  %v224_v38 = vpop.f32.mrb[3].mxu0  ;;  %v256_v39 = vpop.f32.mrb[3].mxu1 }
  0xf9   :  { %v447_v40 = vmul.f32 0.33333334, %v431_v28  ;;  %v455_v41 = vmul.f32 0.33333334, %v439_v29  ;;  %v577_v42 = vpack.c.bf16 %v639_v31, %v638_v21  ;;  %v442_v43 = vadd.f32 %v639_v31, %v426_v27 }
  0xfa   :  { %465 = vst [vmem:[%s898_s4 + $0x10] sm:$0xff] %v449_v34  ;;  %473 = vst [vmem:[%s898_s4 + $0x50] sm:$0xff] %v457_v35  ;;  %v450_v44 = vmul.f32 0.33333334, %v434_v37  ;;  %v552_v45 = vpack.c.bf16 %v224_v38, %v221_v25  ;;  %v432_v46 = vadd.f32 %v416_v32, %v224_v38  ;;  %v572_v47 = vpack.c.bf16 %v256_v39, %v253_v26 }
  0xfb   :  { %589 = vst [vmem:[#allocation3 + $0x8] sm:$0xff] %v557_v36   ;;  %463 = vst [vmem:[%s898_s4] sm:$0xff] %v447_v40  ;;  %v458_v48 = vmul.f32 0.33333334, %v442_v43  ;;  %v440_v49 = vadd.f32 %v424_v33, %v256_v39 }
  0xfc   :  { %471 = vst [vmem:[%s898_s4 + $0x40] sm:$0xff] %v455_v41  ;;  %593 = vst [vmem:[#allocation3 + $0x28] sm:$0xff] %v577_v42   ;;  %v448_v52 = vmul.f32 0.33333334, %v432_v46 }
  0xfd   :  { %553 = vst [vmem:[#allocation3] sm:$0xff] %v552_v45   ;;  %592 = vst [vmem:[#allocation3 + $0x20] sm:$0xff] %v572_v47   ;;  %v456_v55 = vmul.f32 0.33333334, %v440_v49  ;;  %v634_v56 = vpop.f32.mrb[4].mxu0  ;;  %v642_v57 = vpop.f32.mrb[4].mxu1 }
  0xfe   :  { %v237_v61 = vpop.f32.mrb[5].mxu0  ;;  %v269_v62 = vpop.f32.mrb[5].mxu1 }
  0xff   :  { %v635_v2 = vpop.f32.mrb[6].mxu0  ;;  %v643_v3 = vpop.f32.mrb[6].mxu1 }
 0x100   :  { %v567_v8 = vpack.c.bf16 %v635_v2, %v634_v56  ;;  %v240_v10 = vpop.f32.mrb[7].mxu0  ;;  %v272_v11 = vpop.f32.mrb[7].mxu1  ;;  %v587_v14 = vpack.c.bf16 %v643_v3, %v642_v57 }
 0x101   :  { %v562_v17 = vpack.c.bf16 %v240_v10, %v237_v61  ;;  %v582_v19 = vpack.c.bf16 %v272_v11, %v269_v62 }
 0x102   :  { %591 = vst [vmem:[#allocation3 + $0x18] sm:$0xff] %v567_v8   ;;  %595 = vst [vmem:[#allocation3 + $0x38] sm:$0xff] %v587_v14  }
 0x103   :  { %v421_v50 = vld [vmem:[%s896_s2 + $0x30] sm:$0xff]  ;;  %590 = vst [vmem:[#allocation3 + $0x10] sm:$0xff] %v562_v17   ;;  %594 = vst [vmem:[#allocation3 + $0x30] sm:$0xff] %v582_v19  }
 0x104   :  { %v429_v51 = vld [vmem:[%s896_s2 + $0x70] sm:$0xff]  ;;  %v437_v59 = vadd.f32 %v634_v56, %v421_v50 }
 0x105   :  { %466 = vst [vmem:[%s898_s4 + $0x18] sm:$0xff] %v450_v44  ;;  %v445_v60 = vadd.f32 %v642_v57, %v429_v51 }
 0x106   :  { %v453_v6 = vmul.f32 0.33333334, %v437_v59 }
 0x107   :  { %v461_v7 = vmul.f32 0.33333334, %v445_v60 }
 0x10c   :  { %v419_v53 = vld [vmem:[%s896_s2 + $0x20] sm:$0xff] }
 0x10d   :  { %v427_v54 = vld [vmem:[%s896_s2 + $0x60] sm:$0xff]  ;;  %v435_v0 = vadd.f32 %v419_v53, %v237_v61 }
 0x10e   :  { %474 = vst [vmem:[%s898_s4 + $0x58] sm:$0xff] %v458_v48  ;;  %v443_v1 = vadd.f32 %v427_v54, %v269_v62 }
 0x10f   :  { %v451_v12 = vmul.f32 0.33333334, %v435_v0 }
 0x110   :  { %v459_v13 = vmul.f32 0.33333334, %v443_v1 }
 0x115   :  { %v422_v58 = vld [vmem:[%s896_s2 + $0x38] sm:$0xff] }
 0x116   :  { %464 = vst [vmem:[%s898_s4 + $0x8] sm:$0xff] %v448_v52  ;;  %v438_v9 = vadd.f32 %v635_v2, %v422_v58 }
 0x118   :  { %v454_v16 = vmul.f32 0.33333334, %v438_v9 }
 0x11d   :  { %v430_v63 = vld [vmem:[%s896_s2 + $0x78] sm:$0xff] }
 0x11e   :  { %472 = vst [vmem:[%s898_s4 + $0x48] sm:$0xff] %v456_v55  ;;  %v446_v15 = vadd.f32 %v643_v3, %v430_v63 }
 0x120   :  { %v462_v20 = vmul.f32 0.33333334, %v446_v15 }
 0x125   :  { %v420_v4 = vld [vmem:[%s896_s2 + $0x28] sm:$0xff] }
 0x126   :  { %v428_v5 = vld [vmem:[%s896_s2 + $0x68] sm:$0xff]  ;;  %v436_v18 = vadd.f32 %v420_v4, %v240_v10 }
 0x127   :  { %469 = vst [vmem:[%s898_s4 + $0x30] sm:$0xff] %v453_v6  ;;  %477 = vst [vmem:[%s898_s4 + $0x70] sm:$0xff] %v461_v7  ;;  %v444_v21 = vadd.f32 %v428_v5, %v272_v11 }
 0x128   :  { %467 = vst [vmem:[%s898_s4 + $0x20] sm:$0xff] %v451_v12  ;;  %475 = vst [vmem:[%s898_s4 + $0x60] sm:$0xff] %v459_v13  ;;  %v452_v22 = vmul.f32 0.33333334, %v436_v18 }
 0x129   :  { %470 = vst [vmem:[%s898_s4 + $0x38] sm:$0xff] %v454_v16  ;;  %478 = vst [vmem:[%s898_s4 + $0x78] sm:$0xff] %v462_v20  ;;  %v460_v23 = vmul.f32 0.33333334, %v444_v21 }
 0x12a   :  { %690 = shalt.err (!%p687_p4)
}
 0x12b   :  { %s691_s0 = scalar_lea.hbm %s897_s3, 1024 }
 0x12c   :  { %p692_p5 = scmp.ne.s32.totalorder %s897_s3, %s691_s0  ;;  %p695_p6 = scmp.lt.u32.totalorder %s691_s0, %s897_s3 }
 0x12e   :  { %p697_p7 = pnand %p695_p6, %p692_p5 }
 0x130   :  { %700 = shalt.err (!%p697_p7)
}
 0x131   :  { %s704_s6 = smov 64   ;;  %s705_s7 = smov 4   ;;  %468 = vst [vmem:[%s898_s4 + $0x28] sm:$0xff] %v452_v22  ;;  %476 = vst [vmem:[%s898_s4 + $0x68] sm:$0xff] %v460_v23 }
 0x132   :  { %490 = dma.vmem_to_hbm [thread:$0]  %s851_s8, 1024, %s897_s3, [#allocation4], %s704_s6, %s704_s6, %s705_s7  }
 0x133   :  { %701 = dma.done.wait [#allocation4], 1024  }
 0x134   :  { %702 = vsyncadd [#allocation4], 4294966272 }
 0x135   :  { %498 = vsyncpa [#allocation4], 1 }

// kernel: printf_forward.6
= control target key start
LH: loop header
LB: loop body
LE: loop exit
PB: predicated region body
PF: predicated region fallthrough
CT: control target
= control target key end

     0   :  { %s840_s1 = inlined_call_operand.vmem [shape: bf16[128,128], index: 1, kind: input, shape index: {}]   ;;  %s841_s0 = inlined_call_operand.vmem [shape: bf16[128,128], index: 0, kind: input, shape index: {}]   ;;  %s842_s2 = inlined_call_operand.vmem [shape: f32[128,128], index: 2, kind: input, shape index: {}, may-alias: {2,4}]   ;;  %s843_s4 = inlined_call_operand.vmem [shape: f32[128,128], index: 4, kind: output, shape index: {1}, may-alias: {2,4}]   ;;  %s844_s3 = inlined_call_operand.vmem [shape: bf16[128,128], index: 3, kind: output, shape index: {0}]  }
   0x1   :  { %v631_v0 = vld [vmem:[%s840_s1] sm:$0xff]   ;;  %v632_v1 = vld [vmem:[%s840_s1 + $0x8] sm:$0xff]   ;;  %v633_v2 = vld [vmem:[%s840_s1 + $0x10] sm:$0xff]  }
   0x2   :  { %583 = vmatprep.subr.bf16.mxu0 %v631_v0  ;;  %615 = vmatprep.subr.bf16.mxu1 %v631_v0  ;;  %v634_v3 = vld [vmem:[%s840_s1 + $0x18] sm:$0xff]   ;;  %v639_v4 = vld [vmem:[%s841_s0] sm:$0xff]   ;;  %v636_v7 = vld [vmem:[%s840_s1 + $0x28] sm:$0xff]  }
   0x3   :  { %584 = vmatpush3.bf16.msra.mxu0 %v631_v0  ;;  %623 = vmatpush3.bf16.msra.mxu1 %v631_v0  ;;  %v640_v5 = vld [vmem:[%s841_s0 + $0x20] sm:$0xff]   ;;  %v637_v8 = vld [vmem:[%s840_s1 + $0x30] sm:$0xff]   ;;  %v638_v9 = vld [vmem:[%s840_s1 + $0x38] sm:$0xff]  }
   0x4   :  { %585 = vmatprep.subr.bf16.mxu0 %v632_v1  ;;  %616 = vmatprep.subr.bf16.mxu1 %v632_v1  ;;  %v635_v6 = vld [vmem:[%s840_s1 + $0x20] sm:$0xff]   ;;  %v641_v10 = vld [vmem:[%s841_s0 + $0x8] sm:$0xff]   ;;  %v643_v12 = vld [vmem:[%s841_s0 + $0x10] sm:$0xff]  }
   0x5   :  { %599 = vmatprep.mubr.bf16.mxu0 %v639_v4  ;;  %607 = vmatprep.mubr.bf16.mxu1 %v640_v5  ;;  %v642_v11 = vld [vmem:[%s841_s0 + $0x28] sm:$0xff]   ;;  %v644_v13 = vld [vmem:[%s841_s0 + $0x30] sm:$0xff]   ;;  %v645_v14 = vld [vmem:[%s841_s0 + $0x18] sm:$0xff]  }
   0x6   :  { %v646_v15 = vld [vmem:[%s841_s0 + $0x38] sm:$0xff]   ;;  %v416_v16 = vld [vmem:[%s842_s2 + $0x10] sm:$0xff]  ;;  %v414_v18 = vld [vmem:[%s842_s2] sm:$0xff] }
   0x7   :  { %586 = vmatpush3.bf16.msra.mxu0 %v632_v1  ;;  %624 = vmatpush3.bf16.msra.mxu1 %v632_v1  ;;  %v424_v17 = vld [vmem:[%s842_s2 + $0x50] sm:$0xff]  ;;  %v422_v19 = vld [vmem:[%s842_s2 + $0x40] sm:$0xff]  ;;  %v417_v22 = vld [vmem:[%s842_s2 + $0x18] sm:$0xff] }
   0x8   :  { %587 = vmatprep.subr.bf16.mxu0 %v633_v2  ;;  %617 = vmatprep.subr.bf16.mxu1 %v633_v2  ;;  %v425_v23 = vld [vmem:[%s842_s2 + $0x58] sm:$0xff]  ;;  %v415_v28 = vld [vmem:[%s842_s2 + $0x8] sm:$0xff] }
   0x9   :  { %v423_v29 = vld [vmem:[%s842_s2 + $0x48] sm:$0xff] }
   0xb   :  { %588 = vmatpush3.bf16.msra.mxu0 %v633_v2  ;;  %625 = vmatpush3.bf16.msra.mxu1 %v633_v2 }
   0xc   :  { %589 = vmatprep.subr.bf16.mxu0 %v634_v3  ;;  %618 = vmatprep.subr.bf16.mxu1 %v634_v3 }
   0xf   :  { %590 = vmatpush3.bf16.msra.mxu0 %v634_v3  ;;  %626 = vmatpush3.bf16.msra.mxu1 %v634_v3 }
  0x10   :  { %591 = vmatprep.subr.bf16.mxu0 %v635_v6  ;;  %619 = vmatprep.subr.bf16.mxu1 %v635_v6 }
  0x13   :  { %592 = vmatpush3.bf16.msra.mxu0 %v635_v6  ;;  %627 = vmatpush3.bf16.msra.mxu1 %v635_v6 }
  0x14   :  { %593 = vmatprep.subr.bf16.mxu0 %v636_v7  ;;  %620 = vmatprep.subr.bf16.mxu1 %v636_v7 }
  0x17   :  { %594 = vmatpush3.bf16.msra.mxu0 %v636_v7  ;;  %628 = vmatpush3.bf16.msra.mxu1 %v636_v7 }
  0x18   :  { %595 = vmatprep.subr.bf16.mxu0 %v637_v8  ;;  %621 = vmatprep.subr.bf16.mxu1 %v637_v8 }
  0x1b   :  { %596 = vmatpush3.bf16.msra.mxu0 %v637_v8  ;;  %629 = vmatpush3.bf16.msra.mxu1 %v637_v8 }
  0x1c   :  { %597 = vmatprep.subr.bf16.mxu0 %v638_v9  ;;  %622 = vmatprep.subr.bf16.mxu1 %v638_v9 }
  0x1f   :  { %598 = vmatpush3.bf16.msra.mxu0 %v638_v9  ;;  %630 = vmatpush3.bf16.msra.mxu1 %v638_v9 }
  0x22   :  { %600 = vmatmul.mubr.bf16.vlgmr.msra.gmra.mrb[0].mxu0 %v641_v10  ;;  %608 = vmatmul.mubr.bf16.vlgmr.msra.gmra.mrb[0].mxu1 %v642_v11 }
  0x23   :  { %603 = vmatprep.mubr.bf16.mxu0 %v643_v12  ;;  %611 = vmatprep.mubr.bf16.mxu1 %v644_v13 }
  0x2a   :  { %604 = vmatmul.mubr.bf16.gmra.mrb[4].mxu0 %v645_v14  ;;  %612 = vmatmul.mubr.bf16.gmra.mrb[4].mxu1 %v646_v15 }
  0xf5   :  { %v601_v20 = vpop.f32.mrb[0].mxu0  ;;  %v609_v21 = vpop.f32.mrb[0].mxu1 }
  0xf6   :  { %v432_v24 = vadd.f32 %v601_v20, %v416_v16  ;;  %v440_v25 = vadd.f32 %v609_v21, %v424_v17  ;;  %v220_v26 = vpop.f32.mrb[1].mxu0  ;;  %v252_v27 = vpop.f32.mrb[1].mxu1 }
  0xf7   :  { %v430_v30 = vadd.f32 %v414_v18, %v220_v26  ;;  %v438_v31 = vadd.f32 %v422_v19, %v252_v27  ;;  %v602_v32 = vpop.f32.mrb[2].mxu0  ;;  %v610_v33 = vpop.f32.mrb[2].mxu1 }
  0xf8   :  { %448 = vst [vmem:[%s843_s4 + $0x10] sm:$0xff] %v432_v24  ;;  %456 = vst [vmem:[%s843_s4 + $0x50] sm:$0xff] %v440_v25  ;;  %v528_v34 = vpack.c.bf16 %v602_v32, %v601_v20  ;;  %v433_v35 = vadd.f32 %v602_v32, %v417_v22  ;;  %v548_v36 = vpack.c.bf16 %v610_v33, %v609_v21  ;;  %v223_v38 = vpop.f32.mrb[3].mxu0  ;;  %v255_v39 = vpop.f32.mrb[3].mxu1 }
  0xf9   :  { %v441_v37 = vadd.f32 %v610_v33, %v425_v23  ;;  %446 = vst [vmem:[%s843_s4] sm:$0xff] %v430_v30  ;;  %454 = vst [vmem:[%s843_s4 + $0x40] sm:$0xff] %v438_v31  ;;  %v523_v40 = vpack.c.bf16 %v223_v38, %v220_v26  ;;  %v431_v41 = vadd.f32 %v415_v28, %v223_v38 }
  0xfa   :  { %v543_v42 = vpack.c.bf16 %v255_v39, %v252_v27  ;;  %v439_v43 = vadd.f32 %v423_v29, %v255_v39  ;;  %560 = vst [vmem:[%s844_s3 + $0x8] sm:$0xff] %v528_v34   ;;  %449 = vst [vmem:[%s843_s4 + $0x18] sm:$0xff] %v433_v35 }
  0xfb   :  { %564 = vst [vmem:[%s844_s3 + $0x28] sm:$0xff] %v548_v36   ;;  %457 = vst [vmem:[%s843_s4 + $0x58] sm:$0xff] %v441_v37 }
  0xfc   :  { %524 = vst [vmem:[%s844_s3] sm:$0xff] %v523_v40   ;;  %447 = vst [vmem:[%s843_s4 + $0x8] sm:$0xff] %v431_v41 }
  0xfd   :  { %563 = vst [vmem:[%s844_s3 + $0x20] sm:$0xff] %v543_v42   ;;  %455 = vst [vmem:[%s843_s4 + $0x48] sm:$0xff] %v439_v43  ;;  %v605_v48 = vpop.f32.mrb[4].mxu0  ;;  %v613_v49 = vpop.f32.mrb[4].mxu1 }
  0xfe   :  { %v236_v54 = vpop.f32.mrb[5].mxu0  ;;  %v268_v55 = vpop.f32.mrb[5].mxu1 }
  0xff   :  { %v606_v60 = vpop.f32.mrb[6].mxu0  ;;  %v614_v61 = vpop.f32.mrb[6].mxu1 }
 0x100   :  { %v538_v62 = vpack.c.bf16 %v606_v60, %v605_v48  ;;  %v558_v0 = vpack.c.bf16 %v614_v61, %v613_v49  ;;  %v239_v2 = vpop.f32.mrb[7].mxu0  ;;  %v271_v3 = vpop.f32.mrb[7].mxu1 }
 0x101   :  { %v533_v4 = vpack.c.bf16 %v239_v2, %v236_v54  ;;  %v553_v6 = vpack.c.bf16 %v271_v3, %v268_v55 }
 0x102   :  { %562 = vst [vmem:[%s844_s3 + $0x18] sm:$0xff] %v538_v62   ;;  %566 = vst [vmem:[%s844_s3 + $0x38] sm:$0xff] %v558_v0  }
 0x103   :  { %561 = vst [vmem:[%s844_s3 + $0x10] sm:$0xff] %v533_v4   ;;  %565 = vst [vmem:[%s844_s3 + $0x30] sm:$0xff] %v553_v6  }
 0x104   :  { %v420_v44 = vld [vmem:[%s842_s2 + $0x30] sm:$0xff]  ;;  %v418_v46 = vld [vmem:[%s842_s2 + $0x20] sm:$0xff]  ;;  %v421_v50 = vld [vmem:[%s842_s2 + $0x38] sm:$0xff] }
 0x105   :  { %v428_v45 = vld [vmem:[%s842_s2 + $0x70] sm:$0xff]  ;;  %v426_v47 = vld [vmem:[%s842_s2 + $0x60] sm:$0xff]  ;;  %v429_v51 = vld [vmem:[%s842_s2 + $0x78] sm:$0xff]  ;;  %v436_v52 = vadd.f32 %v605_v48, %v420_v44  ;;  %v434_v58 = vadd.f32 %v418_v46, %v236_v54  ;;  %v437_v63 = vadd.f32 %v606_v60, %v421_v50 }
 0x106   :  { %v444_v53 = vadd.f32 %v613_v49, %v428_v45  ;;  %v419_v56 = vld [vmem:[%s842_s2 + $0x28] sm:$0xff]  ;;  %v442_v59 = vadd.f32 %v426_v47, %v268_v55  ;;  %v445_v1 = vadd.f32 %v614_v61, %v429_v51 }
 0x107   :  { %v427_v57 = vld [vmem:[%s842_s2 + $0x68] sm:$0xff]  ;;  %v435_v5 = vadd.f32 %v419_v56, %v239_v2 }
 0x108   :  { %452 = vst [vmem:[%s843_s4 + $0x30] sm:$0xff] %v436_v52  ;;  %460 = vst [vmem:[%s843_s4 + $0x70] sm:$0xff] %v444_v53  ;;  %v443_v7 = vadd.f32 %v427_v57, %v271_v3 }
 0x109   :  { %450 = vst [vmem:[%s843_s4 + $0x20] sm:$0xff] %v434_v58  ;;  %458 = vst [vmem:[%s843_s4 + $0x60] sm:$0xff] %v442_v59 }
 0x10a   :  { %453 = vst [vmem:[%s843_s4 + $0x38] sm:$0xff] %v437_v63  ;;  %461 = vst [vmem:[%s843_s4 + $0x78] sm:$0xff] %v445_v1 }
 0x10b   :  { %451 = vst [vmem:[%s843_s4 + $0x28] sm:$0xff] %v435_v5  ;;  %459 = vst [vmem:[%s843_s4 + $0x68] sm:$0xff] %v443_v7 }

</bundles_post_ra>
